<compile_context>
chip_gen: v5e
topology: v5e:2x2
jax: 0.10.0
libtpu: 0.0.40
codegen_flags: <defaults>
</compile_context>

<pallas_src>
import jax
import jax.numpy as jnp
from jax.experimental import pallas as pl
from jax.experimental.pallas import tpu as pltpu


def _mlp_kernel(x_ref, w1_ref, b1_ref, w2_ref, b2_ref, h1_ref, z_ref):
    # fc1 (bf16 operands, f32 accumulation) + bias + ReLU in f32.
    x = x_ref[...]                                            # (TB, E) bf16
    h1 = jnp.dot(x, w1_ref[...], preferred_element_type=jnp.float32)
    h1 = jnp.maximum(h1 + b1_ref[...], 0.0)                   # broadcast (1, Hp)
    h1_ref[...] = h1.astype(h1_ref.dtype)

    # fc2: reuse h1 straight from registers/VMEM (cast to bf16 for the MXU).
    z = jnp.dot(h1.astype(w2_ref.dtype), w2_ref[...],
                preferred_element_type=jnp.float32)
    z_ref[...] = (z + b2_ref[...]).astype(z_ref.dtype)        # broadcast (1, Cp)


def _round_up(n, m):
    return ((n + m - 1) // m) * m


def mlp_pretrained_vecs_3(x, w1, b1, w2, b2, *, block_rows=256):
    """x: [B, E]; w1: [E, H]; b1: [H]; w2: [H, C]; b2: [C] -> (h1 [B,H], z [B,C]).

    Weights are stored as [in, out] (i.e. transposed vs. PyTorch's [out, in]).
    """
    B, E = x.shape
    H = w1.shape[1]
    C = w2.shape[1]

    # Lane-dense (128) padding for matmul output dims, sublane (8) / batch-tile
    # padding for rows. Padded weight/bias entries are zero, so the valid
    # region of the outputs is unchanged; padding is sliced off below.
    H_pad = _round_up(H, 128)
    C_pad = _round_up(C, 128)
    TB = block_rows if B >= block_rows else _round_up(B, 8)
    B_pad = _round_up(B, TB)

    # bf16 operands for the MXU; biases stay f32 (added after f32 accumulation).
    x_p = jnp.zeros((B_pad, E), jnp.bfloat16).at[:B, :].set(x.astype(jnp.bfloat16))
    w1_p = jnp.zeros((E, H_pad), jnp.bfloat16).at[:, :H].set(w1.astype(jnp.bfloat16))
    w2_p = jnp.zeros((H_pad, C_pad), jnp.bfloat16).at[:H, :C].set(w2.astype(jnp.bfloat16))
    b1_p = jnp.zeros((1, H_pad), jnp.float32).at[0, :H].set(b1.astype(jnp.float32))
    b2_p = jnp.zeros((1, C_pad), jnp.float32).at[0, :C].set(b2.astype(jnp.float32))

    grid = (B_pad // TB,)
    grid_spec = pl.GridSpec(
        grid=grid,
        in_specs=[
            pl.BlockSpec((TB, E), lambda i: (i, 0)),        # x: tiled over batch
            pl.BlockSpec((E, H_pad), lambda i: (0, 0)),     # W1: resident
            pl.BlockSpec((1, H_pad), lambda i: (0, 0)),     # b1: resident
            pl.BlockSpec((H_pad, C_pad), lambda i: (0, 0)),  # W2: resident
            pl.BlockSpec((1, C_pad), lambda i: (0, 0)),     # b2: resident
        ],
        out_specs=[
            pl.BlockSpec((TB, H_pad), lambda i: (i, 0)),    # h1: lane-dense
            pl.BlockSpec((TB, C_pad), lambda i: (i, 0)),    # z : lane-dense
        ],
    )

    h1_p, z_p = pl.pallas_call(
        _mlp_kernel,
        out_shape=(
            jax.ShapeDtypeStruct((B_pad, H_pad), jnp.float32),
            jax.ShapeDtypeStruct((B_pad, C_pad), jnp.float32),
        ),
        grid_spec=grid_spec,
        compiler_params=pltpu.CompilerParams(
            dimension_semantics=("parallel",)),  # batch axis -> both TCs on v7x
    )(x_p, w1_p, b1_p, w2_p, b2_p)

    # TODO(synk): at this tiny problem size wall time is pallas_call launch
    # overhead; amortize by stacking many independent batches along the grid.
    return h1_p[:B, :H], z_p[:B, :C]


def _init_linear(key, in_features, out_features, dtype=jnp.float32):
    """Deterministic nn.Linear-style init: U(-1/sqrt(in), 1/sqrt(in))."""
    kw, kb = jax.random.split(key)
    bound = 1.0 / jnp.sqrt(jnp.asarray(in_features, dtype))
    # Stored as [in, out] (i.e. W.T relative to PyTorch's [out, in]).
    w = jax.random.uniform(kw, (in_features, out_features), dtype,
                           minval=-bound, maxval=bound)
    b = jax.random.uniform(kb, (out_features,), dtype,
                           minval=-bound, maxval=bound)
    return w, b


if __name__ == "__main__":
    # Small shapes consistent with the module: batch=8, embed_dim=32,
    # hidden_size=32, num_class=8.
    B, EMBED_DIM, HIDDEN_SIZE, NUM_CLASS = 8, 32, 32, 8

    key = jax.random.PRNGKey(0)
    kx, k1, k2 = jax.random.split(key, 3)

    x = jax.random.normal(kx, (B, EMBED_DIM), jnp.float32)
    w1, b1 = _init_linear(k1, EMBED_DIM, HIDDEN_SIZE)
    w2, b2 = _init_linear(k2, HIDDEN_SIZE, NUM_CLASS)

    h1, z = mlp_pretrained_vecs_3(x, w1, b1, w2, b2)
    jax.block_until_ready((h1, z))

    # Reference check in plain JAX (f32 reference; kernel uses bf16 operands
    # with f32 accumulation, so compare at bf16-level tolerance).
    h1_ref = jnp.maximum(x @ w1 + b1, 0.0)
    z_ref = h1_ref @ w2 + b2
    assert h1.shape == (B, HIDDEN_SIZE) and z.shape == (B, NUM_CLASS)
    assert jnp.allclose(h1, h1_ref, atol=2e-2, rtol=2e-2)
    assert jnp.allclose(z, z_ref, atol=2e-2, rtol=2e-2)

    print("KERNEL_OK")
</pallas_src>

<mosaic_0001>
module attributes {stable_mosaic.version = 11 : i64} {
  func.func @_mlp_kernel(%arg0: i32, %arg1: memref<8x32xbf16, #tpu.memory_space<vmem>>, %arg2: memref<32x128xbf16, #tpu.memory_space<vmem>>, %arg3: memref<1x128xf32, #tpu.memory_space<vmem>>, %arg4: memref<128x128xbf16, #tpu.memory_space<vmem>>, %arg5: memref<1x128xf32, #tpu.memory_space<vmem>>, %arg6: memref<8x128xf32, #tpu.memory_space<vmem>>, %arg7: memref<8x128xf32, #tpu.memory_space<vmem>>) attributes {dimension_semantics = [#tpu.dimension_semantics<parallel>], iteration_bounds = array<i64: 1>, scalar_prefetch = 0 : i64, scratch_operands = 0 : i64, tpu.core_type = #tpu.core_type<tc>, window_params = [{transform_indices = @transform_0, window_bounds = array<i64: 8, 32>}, {pipeline_mode = #tpu.pipeline_mode<synchronous>, transform_indices = @transform_1, window_bounds = array<i64: 32, 128>}, {pipeline_mode = #tpu.pipeline_mode<synchronous>, transform_indices = @transform_2, window_bounds = array<i64: 1, 128>}, {pipeline_mode = #tpu.pipeline_mode<synchronous>, transform_indices = @transform_3, window_bounds = array<i64: 128, 128>}, {pipeline_mode = #tpu.pipeline_mode<synchronous>, transform_indices = @transform_4, window_bounds = array<i64: 1, 128>}, {transform_indices = @transform_5, window_bounds = array<i64: 8, 128>}, {transform_indices = @transform_6, window_bounds = array<i64: 8, 128>}]} {
    %c0 = arith.constant 0 : index
    %c0_0 = arith.constant 0 : index
    %0 = vector.load %arg1[%c0, %c0_0] : memref<8x32xbf16, #tpu.memory_space<vmem>>, vector<8x32xbf16>
    %c0_1 = arith.constant 0 : index
    %c0_2 = arith.constant 0 : index
    %1 = vector.load %arg2[%c0_1, %c0_2] : memref<32x128xbf16, #tpu.memory_space<vmem>>, vector<32x128xbf16>
    %cst = arith.constant dense<0.000000e+00> : vector<8x128xf32>
    %2 = tpu.matmul %0, %1, %cst {dimension_numbers = #tpu.dot_dimension_numbers<[1], [0], [0], [1], [0, 0, 1, 1], [], []>} : vector<8x32xbf16>, vector<32x128xbf16>, vector<8x128xf32> -> vector<8x128xf32>
    %c0_3 = arith.constant 0 : index
    %c0_4 = arith.constant 0 : index
    %3 = vector.load %arg3[%c0_3, %c0_4] : memref<1x128xf32, #tpu.memory_space<vmem>>, vector<1x128xf32>
    %4 = vector.broadcast %3 : vector<1x128xf32> to vector<8x128xf32>
    %5 = arith.addf %2, %4 : vector<8x128xf32>
    %cst_5 = arith.constant 0.000000e+00 : f32
    %6 = vector.broadcast %cst_5 : f32 to vector<8x128xf32>
    %7 = arith.maximumf %5, %6 : vector<8x128xf32>
    %c0_6 = arith.constant 0 : index
    %c0_7 = arith.constant 0 : index
    %8 = vector.load %arg6[%c0_6, %c0_7] : memref<8x128xf32, #tpu.memory_space<vmem>>, vector<8x128xf32>
    tpu.vector_store %arg6[%c0_6, %c0_7], %7 {strides = array<i32>} : memref<8x128xf32, #tpu.memory_space<vmem>>, vector<8x128xf32>,
    %9 = arith.truncf %7 : vector<8x128xf32> to vector<8x128xbf16>
    %c0_8 = arith.constant 0 : index
    %c0_9 = arith.constant 0 : index
    %10 = vector.load %arg4[%c0_8, %c0_9] : memref<128x128xbf16, #tpu.memory_space<vmem>>, vector<128x128xbf16>
    %cst_10 = arith.constant dense<0.000000e+00> : vector<8x128xf32>
    %11 = tpu.matmul %9, %10, %cst_10 {dimension_numbers = #tpu.dot_dimension_numbers<[1], [0], [0], [1], [0, 0, 1, 1], [], []>} : vector<8x128xbf16>, vector<128x128xbf16>, vector<8x128xf32> -> vector<8x128xf32>
    %c0_11 = arith.constant 0 : index
    %c0_12 = arith.constant 0 : index
    %12 = vector.load %arg5[%c0_11, %c0_12] : memref<1x128xf32, #tpu.memory_space<vmem>>, vector<1x128xf32>
    %13 = vector.broadcast %12 : vector<1x128xf32> to vector<8x128xf32>
    %14 = arith.addf %11, %13 : vector<8x128xf32>
    %c0_13 = arith.constant 0 : index
    %c0_14 = arith.constant 0 : index
    %15 = vector.load %arg7[%c0_13, %c0_14] : memref<8x128xf32, #tpu.memory_space<vmem>>, vector<8x128xf32>
    tpu.vector_store %arg7[%c0_13, %c0_14], %14 {strides = array<i32>} : memref<8x128xf32, #tpu.memory_space<vmem>>, vector<8x128xf32>,
    return
  }
  func.func @transform_0(%arg0: i32) -> (i32, i32) {
    %c0_i32 = arith.constant 0 : i32
    %c0_i32_0 = arith.constant 0 : i32
    return %arg0, %c0_i32 : i32, i32
  }
  func.func @transform_1(%arg0: i32) -> (i32, i32) {
    %c0_i32 = arith.constant 0 : i32
    %c0_i32_0 = arith.constant 0 : i32
    %c0_i32_1 = arith.constant 0 : i32
    return %c0_i32, %c0_i32_0 : i32, i32
  }
  func.func @transform_2(%arg0: i32) -> (i32, i32) {
    %c0_i32 = arith.constant 0 : i32
    %c0_i32_0 = arith.constant 0 : i32
    %c0_i32_1 = arith.constant 0 : i32
    return %c0_i32, %c0_i32_0 : i32, i32
  }
  func.func @transform_3(%arg0: i32) -> (i32, i32) {
    %c0_i32 = arith.constant 0 : i32
    %c0_i32_0 = arith.constant 0 : i32
    %c0_i32_1 = arith.constant 0 : i32
    return %c0_i32, %c0_i32_0 : i32, i32
  }
  func.func @transform_4(%arg0: i32) -> (i32, i32) {
    %c0_i32 = arith.constant 0 : i32
    %c0_i32_0 = arith.constant 0 : i32
    %c0_i32_1 = arith.constant 0 : i32
    return %c0_i32, %c0_i32_0 : i32, i32
  }
  func.func @transform_5(%arg0: i32) -> (i32, i32) {
    %c0_i32 = arith.constant 0 : i32
    %c0_i32_0 = arith.constant 0 : i32
    return %arg0, %c0_i32 : i32, i32
  }
  func.func @transform_6(%arg0: i32) -> (i32, i32) {
    %c0_i32 = arith.constant 0 : i32
    %c0_i32_0 = arith.constant 0 : i32
    return %arg0, %c0_i32 : i32, i32
  }
}

</mosaic_0001>

<bundles_post_ra>
// kernel: tpu_custom_call.1
= control target key start
LH: loop header
LB: loop body
LE: loop exit
PB: predicated region body
PF: predicated region fallthrough
CT: control target
= control target key end

     0   :  { %12 = vsyncpa [#allocation3], 0  ;;  %s478_s0 = inlined_call_operand.hbm [shape: bf16[8,32], index: 0, kind: input, shape index: {}]   ;;  %s479_s1 = inlined_call_operand.hbm [shape: bf16[32,128], index: 1, kind: input, shape index: {}]   ;;  %s480_s2 = inlined_call_operand.vmem [shape: f32[1,128], index: 2, kind: input, shape index: {}]   ;;  %s481_s3 = inlined_call_operand.hbm [shape: bf16[128,128], index: 3, kind: input, shape index: {}]   ;;  %s482_s4 = inlined_call_operand.vmem [shape: f32[1,128], index: 4, kind: input, shape index: {}]   ;;  %s483_s5 = inlined_call_operand.hbm [shape: f32[8,128], index: 5, kind: output, shape index: {0}]   ;;  %s484_s6 = inlined_call_operand.hbm [shape: f32[8,128], index: 6, kind: output, shape index: {1}]  }
   0x1   :  { %13 = vsyncpa [#allocation6], 0 }
   0x2   :  { %14 = vsyncpa [#allocation4], 0  ;;  %s31_s23 = sshll.u32 %s479_s1, 4  ;;  %s32_s23 = int_to_ptr.hbm [resolvable:$true] %s31_s23 }
   0x3   :  { %15 = vsyncpa [#allocation10], 0  ;;  %s415_s24 = smov [#allocation5]   ;;  %s21_s28 = sshll.u32 %s478_s0, 4  ;;  %s22_s28 = int_to_ptr.hbm [resolvable:$true] %s21_s28 }
   0x4   :  { %s33_s25 = sshll.u32 %s415_s24, 4  ;;  %s416_s29 = smov 64   ;;  %s34_s25 = int_to_ptr.vmem [resolvable:$true] %s33_s25 }
   0x5   :  { %s417_s30 = smov 4   ;;  %s418_s7 = smov [#allocation2]  }
   0x6   :  { %39 = dma.hbm_to_vmem [thread:$0]  %s32_s23, 256, %s34_s25, [#allocation6], %s416_s29, %s416_s29, %s417_s30  }
   0x7   :  { %s23_s8 = sshll.u32 %s418_s7, 4  ;;  %s46_s11 = sshll.u32 %s481_s3, 4  ;;  %s24_s8 = int_to_ptr.vmem [resolvable:$true] %s23_s8  ;;  %s47_s11 = int_to_ptr.hbm [resolvable:$true] %s46_s11 }
   0x8   :  { %26 = dma.hbm_to_vmem [thread:$0]  %s22_s28, 64, %s24_s8, [#allocation3]  }
   0x9   :  { %s419_s1 = smov [#allocation7]  }
   0xa   :  { %s48_s12 = sshll.u32 %s419_s1, 4  ;;  %s49_s12 = int_to_ptr.vmem [resolvable:$true] %s48_s12 }
   0xb   :  { %54 = dma.hbm_to_vmem [thread:$0]  %s47_s11, 1024, %s49_s12, [#allocation6], %s416_s29, %s416_s29, %s417_s30  }
   0xc   :  { %407 = dma.done.wait [#allocation3], 64  }
   0xd   :  { %408 = vsyncadd [#allocation3], 4294967232 }
   0xe   :  { %409 = dma.done.wait [#allocation6], 1280  }
   0xf   :  { %410 = vsyncadd [#allocation6], 4294966016  ;;  %v269_v0 = vld [vmem:[#allocation5 + $0x8] sm:$0xff]  ;;  %v268_v2 = vld [vmem:[#allocation5] sm:$0xff]  ;;  %vm91_vm0 = vcmask 261120   ;;  %s420_s13 = smov [#allocation8]  }
  0x10   :  { %v277_v1 = vld [vmem:[#allocation7 + $0x38] sm:$0xff]  ;;  %101 = vmatpush.bf16.msra.mxu0 %v269_v0  ;;  %v276_v3 = vld [vmem:[#allocation7 + $0x30] sm:$0xff]  ;;  %v70_v4 = vld [vmem:[#allocation2] sm:$0xf]  ;;  %s198_s14 = sshll.u32 %s420_s13, 4  ;;  %s200_s17 = sshll.u32 %s483_s5, 4  ;;  %s199_s14 = int_to_ptr.vmem [resolvable:$true] %s198_s14  ;;  %s201_s17 = int_to_ptr.hbm [resolvable:$true] %s200_s17 }
  0x11   :  { %179 = vmatpush.bf16.msra.mxu1 %v277_v1  ;;  %v275_v5 = vld [vmem:[#allocation7 + $0x28] sm:$0xff]  ;;  %v274_v6 = vld [vmem:[#allocation7 + $0x20] sm:$0xff]  ;;  %v273_v7 = vld [vmem:[#allocation7 + $0x18] sm:$0xff]  ;;  %s211_s23 = sshll.u32 %s484_s6, 4  ;;  %s212_s23 = int_to_ptr.hbm [resolvable:$true] %s211_s23 }
  0x12   :  { %v272_v8 = vld [vmem:[#allocation7 + $0x10] sm:$0xff]  ;;  %v271_v9 = vld [vmem:[#allocation7 + $0x8] sm:$0xff]  ;;  %v270_v10 = vld [vmem:[#allocation7] sm:$0xff] }
  0x13   :  { %v285_v11 = vld [vmem:[%s480_s2] ss:$0 sm:$0xff]  ;;  %s421_s2 = smov [#allocation9]  }
  0x14   :  { %102 = vmatpush.bf16.msra.mxu0 %v268_v2  ;;  %v286_v17 = vld [vmem:[%s482_s4] ss:$0 sm:$0xff]  ;;  %s209_s20 = sshll.u32 %s421_s2, 4  ;;  %s210_s20 = int_to_ptr.vmem [resolvable:$true] %s209_s20 }
  0x15   :  { %180 = vmatpush.bf16.msra.mxu1 %v276_v3 }
  0x17   :  { %235 = vmatmul.msk.bf16.vlgmr.msra.gmra.mxu0 %vm91_vm0, %v70_v4 }
  0x19   :  { %181 = vmatpush.bf16.msra.mxu1 %v275_v5 }
  0x1d   :  { %182 = vmatpush.bf16.msra.mxu1 %v274_v6 }
  0x21   :  { %183 = vmatpush.bf16.msra.mxu1 %v273_v7 }
  0x25   :  { %184 = vmatpush.bf16.msra.mxu1 %v272_v8 }
  0x29   :  { %185 = vmatpush.bf16.msra.mxu1 %v271_v9 }
  0x2d   :  { %186 = vmatpush.bf16.msra.mxu1 %v270_v10 }
  0x94   :  { %v104_v12 = vpop.f32.mrf.mxu0 }
  0x95   :  { %v105_v13 = vadd.f32 %v285_v11, %v104_v12 }
  0x97   :  { %v108_v14 = vmax.f32 %v105_v13, 0.0 }
  0x99   :  { %109 = vst [vmem:[#allocation8] sm:$0xff] %v108_v14  ;;  %v110_v15 = vpack.c.bf16 %v108_v14, %v108_v14 }
  0x9a   :  { %203 = dma.vmem_to_hbm [thread:$0]  %s199_s14, 128, %s201_s17, [#allocation4]  }
  0x9b   :  { %187 = vmatmul.bf16.vlgmr.msra.gmra.mxu1 %v110_v15 }
  0x9c   :  { %v106_v16 = vpop.f32.mrf.mxu0 }
 0x118   :  { %v188_v18 = vpop.f32.mrf.mxu1 }
 0x119   :  { %v189_v19 = vadd.f32 %v286_v17, %v188_v18 }
 0x11b   :  { %192 = vst [vmem:[#allocation9] sm:$0xff] %v189_v19 }
 0x11c   :  { %214 = dma.vmem_to_hbm [thread:$0]  %s210_s20, 128, %s212_s23, [#allocation10]  }
 0x120   :  { %v190_v20 = vpop.f32.mrf.mxu1 }
 0x121   :  { %411 = dma.done.wait [#allocation4], 128  }
 0x122   :  { %412 = vsyncadd [#allocation4], 4294967168 }
 0x123   :  { %413 = dma.done.wait [#allocation10], 128  }
 0x124   :  { %414 = vsyncadd [#allocation10], 4294967168 }
 0x125   :  { %223 = vsyncpa [#allocation3], 1 }
 0x126   :  { %224 = vsyncpa [#allocation6], 1 }
 0x127   :  { %225 = vsyncpa [#allocation4], 1 }
 0x128   :  { %226 = vsyncpa [#allocation10], 1 }

</bundles_post_ra>
